<compile_context>
chip_gen: v7x
topology: tpu7x:2x2x1
jax: 0.10.0
libtpu: 0.0.40
codegen_flags: <defaults>
</compile_context>

<pallas_src>
import math

import jax
import jax.numpy as jnp
from jax import lax
from jax.experimental import pallas as pl
from jax.experimental.pallas import tpu as pltpu

_OFF = 8              # column offset of the image inside the pad scratch (f32 sublane aligned)
_PAD_CH = 64          # channel capacity of the pad scratch (max Cin of any 3x3 conv)
_BAND_CAP = 128       # max output rows per band (overridden in __main__ for validation)
_VMEM_BUDGET = 16 * 1024 * 1024   # budget the band chooser targets (headroom vs vmem limit)
_VMEM_LIMIT = 40 * 1024 * 1024    # explicit scoped-VMEM limit (fits v5e/v6e/v7x)
_ROLL_SIGN = 1        # set by _detect_roll_sign() in __main__


def _round_up(x, m):
    return -(-x // m) * m


# ---------------------------------------------------------------------------
# pltpu.roll direction probe (one tiny kernel, run once)
# ---------------------------------------------------------------------------

def _roll_probe_kernel(x_ref, o_ref):
    o_ref[...] = pltpu.roll(x_ref[...], 1, axis=1)


def _detect_roll_sign():
    """Return s such that pltpu.roll(x, s*k, axis) == jnp.roll(x, k, axis)."""
    x = lax.broadcasted_iota(jnp.float32, (2, 8, 128), 1)
    y = pl.pallas_call(
        _roll_probe_kernel,
        out_shape=jax.ShapeDtypeStruct((2, 8, 128), jnp.float32))(x)
    v = float(y[0, 0, 0])
    assert v in (1.0, 7.0), f"unexpected pltpu.roll behaviour: {v}"
    return 1 if v == 7.0 else -1


# ---------------------------------------------------------------------------
# In-kernel building blocks (operate on VMEM values of one row band)
# ---------------------------------------------------------------------------

def _conv_bn(pad_ref, mask, x, w, b, act):
    """'same' conv (1x1 or 3x3, stride 1) of a row band x:(R,W,Cin) -> (R,W,Cout) f32.

    3x3 path: the band (with out-of-image rows masked to zero) is stored into
    the zero-bordered scratch at an aligned offset, the three dy taps are
    lane-concatenated once, and the dx = +-1 taps are produced by rotating the
    padded width with pltpu.roll (XLU) -- no unaligned sublane reads.  Three
    K=3*Cin bf16 MXU matmuls accumulate into an f32 value.
    """
    R, W, Cin = x.shape
    if w.ndim == 2:                                   # 1x1 conv
        acc = jnp.einsum('rwc,cd->rwd', x.astype(jnp.bfloat16), w,
                         preferred_element_type=jnp.float32)
    else:                                             # 3x3 conv: w is (3, 3*Cin, Cout)
        assert Cin <= _PAD_CH and w.shape[1] == 3 * Cin
        Wp = pad_ref.shape[1]
        pad_ref[1:1 + R, _OFF:_OFF + W, :Cin] = (x * mask).astype(jnp.float32)
        ycat = jnp.concatenate(
            [pad_ref[dy:dy + R, :, :Cin] for dy in range(3)], axis=-1)  # (R, Wp, 3*Cin)
        acc = None
        for dx in range(3):
            if Cin >= 8:
                # aligned read + XLU rotate; border columns of the scratch are
                # zero so the rotate reproduces the 'same' zero padding in W.
                sh = (_ROLL_SIGN * (1 - dx)) % Wp
                rolled = ycat if sh == 0 else pltpu.roll(ycat, sh, axis=1)
                lhs = rolled[:, _OFF:_OFF + W, :]
            else:
                # degenerate Cin (=1): tiny data, plain shifted value slice.
                lhs = ycat[:, _OFF - 1 + dx:_OFF - 1 + dx + W, :]
            part = jnp.einsum('rwc,cd->rwd', lhs.astype(jnp.bfloat16), w[dx],
                              preferred_element_type=jnp.float32)
            acc = part if acc is None else acc + part
    if b is not None:
        acc = acc + b
    if act == 'relu':
        acc = jnp.maximum(acc, 0.0)
    elif act == 'sigmoid':
        acc = jax.nn.sigmoid(acc)
    return acc


def _resblock(ctx, x, ps):
    y = _conv_bn(*ctx, x, ps[0], ps[1], 'relu')
    y = _conv_bn(*ctx, y, ps[2], ps[3], 'relu')
    x1 = y
    y = _conv_bn(*ctx, y, ps[4], ps[5], 'relu')
    y = _conv_bn(*ctx, y, ps[6], ps[7], 'relu')
    return x + x1 + y


def _seq_chain(ctx, x, ps):
    y = _conv_bn(*ctx, x, ps[0], ps[1], 'none')
    y = _resblock(ctx, y, ps[2:10])
    return _conv_bn(*ctx, y, ps[10], ps[11], 'relu')


# Fused bodies: body(ctx, xs, ps) -> list of (R, W, Cout) f32 values.

def _seq_body(ctx, xs, ps):
    return [_seq_chain(ctx, xs[0], ps)]


def _ff_seq_body(ctx, xs, ps):
    x = jnp.concatenate([xs[0], xs[1]], axis=-1)          # (R, W, 128)
    y = _conv_bn(*ctx, x, ps[0], ps[1], 'none')            # 1x1 fusion, 128 -> 64
    return [_seq_chain(ctx, y, ps[2:])]


def _tail_body(ctx, xs, ps):
    s = xs[0] + xs[1] + xs[2] + xs[3]
    e5 = _conv_bn(*ctx, s, ps[0], ps[1], 'none')
    y = _resblock(ctx, e5, ps[2:10])
    y = _conv_bn(*ctx, y, ps[10], ps[11], 'none')
    return [y, e5]


def _sam_body(ctx, xs, ps):
    # xs = [e5, x_raw]; ps = [w_img(1x1), w1(3x3), w3(3x3)]  (all bias-free)
    x_img = _conv_bn(*ctx, xs[1], ps[0], None, 'none')
    x1 = _conv_bn(*ctx, xs[0], ps[1], None, 'relu')
    gate = _conv_bn(*ctx, x1, ps[2], None, 'sigmoid')       # (R, W, 1), never leaves VMEM
    return [x_img * gate]


def _conv_body(ctx, xs, ps):
    return [_conv_bn(*ctx, xs[0], ps[0], ps[1], 'none')]


# ---------------------------------------------------------------------------
# Generic fused pallas_call with row-band + halo tiling
# ---------------------------------------------------------------------------

def _pick_band(H, W, n_act, halo):
    """Largest band (divisor of H, <= _BAND_CAP) whose buffers fit the budget."""
    wp = _round_up(W + 2 * _OFF, 8)
    for band in sorted({d for d in range(1, H + 1) if H % d == 0}, reverse=True):
        if band > _BAND_CAP:
            continue
        r = band + 2 * halo
        est = (r + 2) * wp * _PAD_CH * 4            # f32 pad scratch
        est += r * wp * 3 * _PAD_CH * 4             # dy-concat / rolled taps (transient)
        est += 2 * n_act * r * W * _PAD_CH * 4      # double-buffered input bands
        est += 2 * band * W * _PAD_CH * 4           # double-buffered output bands
        if est <= _VMEM_BUDGET:
            return band
    return 1


def _make_kernel(body, n_act, n_out, H, W, band, halo):
    R = band + 2 * halo

    def kernel(*refs):
        acts = refs[:n_act]
        params = [r[...] for r in refs[n_act:len(refs) - n_out - 1]]
        outs = refs[len(refs) - n_out - 1:len(refs) - 1]
        pad_ref = refs[-1]

        # Border-only zeroing of the pad scratch (interior is overwritten before
        # every read); done every step so it is megacore-shard safe.
        Wp, Cp = pad_ref.shape[1], pad_ref.shape[2]
        pad_ref[:, :_OFF, :] = jnp.zeros((R + 2, _OFF, Cp), jnp.float32)
        pad_ref[:, _OFF + W:, :] = jnp.zeros((R + 2, Wp - _OFF - W, Cp), jnp.float32)
        zrow = jnp.zeros((1, W, Cp), jnp.float32)
        pad_ref[0:1, _OFF:_OFF + W, :] = zrow
        pad_ref[R + 1:R + 2, _OFF:_OFF + W, :] = zrow

        # Row mask: 1 for rows inside the original image, 0 for the padded /
        # out-of-image halo rows (re-applied before every 3x3 conv so chained
        # 'same' convs see the correct zero padding at the true image border).
        g0 = pl.program_id(1) * band - halo
        rows = lax.broadcasted_iota(jnp.int32, (R, 1, 1), 0) + g0
        mask = ((rows >= 0) & (rows < H)).astype(jnp.float32)

        xs = [r[0].astype(jnp.float32) for r in acts]       # each (R, W, C)
        ys = body((pad_ref, mask), xs, params)
        for o_ref, y in zip(outs, ys):
            o_ref[0] = y[halo:halo + band].astype(o_ref.dtype)

    return kernel


def _fused_call(body, acts, params, out_channels, halo, out_dtypes):
    N, H, W = acts[0].shape[0], acts[0].shape[1], acts[0].shape[2]
    band = _pick_band(H, W, len(acts), halo)
    nb = H // band
    R = band + 2 * halo
    Wp = _round_up(W + 2 * _OFF, 8)

    # Overlapping row bands (with halo) built by the wrapper; plain Blocked
    # BlockSpecs then stream them through the normal Pallas pipeline.
    def band_stack(a):
        a_pad = jnp.pad(a, ((0, 0), (halo, halo), (0, 0), (0, 0)))
        s = jnp.stack([a_pad[:, i * band:i * band + R] for i in range(nb)], axis=1)
        return s.reshape(N * nb, R, W, a.shape[-1])

    act_stacks = [band_stack(a) for a in acts]

    in_specs = [pl.BlockSpec((1, R, W, a.shape[-1]),
                             lambda n, b, _nb=nb: (n * _nb + b, 0, 0, 0))
                for a in acts]
    in_specs += [pl.BlockSpec(p.shape, lambda n, b, _nd=p.ndim: (0,) * _nd)
                 for p in params]

    out_shape = tuple(jax.ShapeDtypeStruct((N, H, W, c), dt)
                      for c, dt in zip(out_channels, out_dtypes))
    out_specs = tuple(pl.BlockSpec((1, band, W, c), lambda n, b: (n, b, 0, 0))
                      for c in out_channels)

    kernel = _make_kernel(body, len(acts), len(out_channels), H, W, band, halo)
    fn = pl.pallas_call(
        kernel,
        out_shape=out_shape,
        grid=(N, nb),
        in_specs=in_specs,
        out_specs=out_specs,
        scratch_shapes=[pltpu.VMEM((R + 2, Wp, _PAD_CH), jnp.float32)],
        compiler_params=pltpu.CompilerParams(
            dimension_semantics=("parallel", "parallel"),
            vmem_limit_bytes=_VMEM_LIMIT),
    )
    return fn(*act_stacks, *params)


# ---------------------------------------------------------------------------
# Weight prep + per-module call wrappers
# ---------------------------------------------------------------------------

def _prep_conv(p):
    """HWIO weight -> bf16 (3, 3*Cin, Cout) [3x3, dx-major/dy-minor] or (Cin, Cout) [1x1]."""
    w = p['w']
    K, _, Cin, Cout = w.shape
    if K == 1:
        w2 = w.reshape(Cin, Cout).astype(jnp.bfloat16)
    else:
        w2 = w.transpose(1, 0, 2, 3).reshape(K, K * Cin, Cout).astype(jnp.bfloat16)
    b = p['b']
    b2 = None if b is None else b.reshape(1, Cout).astype(jnp.float32)
    return w2, b2


def _seq_flat_params(p):
    out = list(_prep_conv(p['conv1']))
    for i in range(1, 5):
        out += list(_prep_conv(p['res'][f'conv{i}']))
    out += list(_prep_conv(p['conv2']))
    return out


def seq_call(p, x):
    return _fused_call(_seq_body, [x], _seq_flat_params(p), [64], halo=6,
                       out_dtypes=[jnp.bfloat16])[0]


def ff_seq_call(ff_p, seq_p, a, b):
    params = list(_prep_conv(ff_p)) + _seq_flat_params(seq_p)
    return _fused_call(_ff_seq_body, [a, b], params, [64], halo=6,
                       out_dtypes=[jnp.bfloat16])[0]


def tail_call(conv2_p, res_p, conv3_p, e1, a, b, c):
    params = list(_prep_conv(conv2_p))
    for i in range(1, 5):
        params += list(_prep_conv(res_p[f'conv{i}']))
    params += list(_prep_conv(conv3_p))
    cout = conv3_p['w'].shape[-1]
    y, e5 = _fused_call(_tail_body, [e1, a, b, c], params, [cout, 64], halo=6,
                        out_dtypes=[jnp.float32, jnp.bfloat16])
    return y, e5


def sam_call(sam_p, img_conv_p, e5, x_raw):
    params = [_prep_conv(img_conv_p)[0], _prep_conv(sam_p['conv1'])[0],
              _prep_conv(sam_p['conv3'])[0]]
    return _fused_call(_sam_body, [e5, x_raw], params, [64], halo=2,
                       out_dtypes=[jnp.bfloat16])[0]


def conv_call(p, x):
    w2, b2 = _prep_conv(p)
    return _fused_call(_conv_body, [x], [w2, b2], [p['w'].shape[-1]], halo=1,
                       out_dtypes=[jnp.bfloat16])[0]


# ---------------------------------------------------------------------------
# Plain-JAX glue (pooling / bilinear resize)
# ---------------------------------------------------------------------------

def maxpool2x2(x):
    N, H, W, C = x.shape
    return jnp.max(x.reshape(N, H // 2, 2, W // 2, 2, C), axis=(2, 4))


def _interp_matrix(n_in, n_out):
    # nn.Upsample(mode='bilinear', align_corners=True), separable 1-D weights.
    if n_in == 1:
        return jnp.ones((n_out, 1), jnp.float32)
    src = jnp.arange(n_out, dtype=jnp.float32) * (n_in - 1) / (n_out - 1)
    lo = jnp.clip(jnp.floor(src).astype(jnp.int32), 0, n_in - 2)
    frac = src - lo.astype(jnp.float32)
    m = jnp.zeros((n_out, n_in), jnp.float32)
    idx = jnp.arange(n_out)
    m = m.at[idx, lo].add(1.0 - frac)
    m = m.at[idx, lo + 1].add(frac)
    return m


def upsample_bilinear(x, factor):
    N, H, W, C = x.shape
    mh = _interp_matrix(H, H * factor)
    mw = _interp_matrix(W, W * factor)
    y = jnp.einsum('ah,nhwc->nawc', mh, x)
    y = jnp.einsum('bw,nawc->nabc', mw, y)
    return y.astype(x.dtype)


# ---------------------------------------------------------------------------
# Deterministic parameter init (matches nn.Conv2d shapes; synthetic values)
# ---------------------------------------------------------------------------

def conv_params(key, cin, cout, k, bias=True):
    kw, kb = jax.random.split(key)
    bound = 1.0 / math.sqrt(cin * k * k)
    w = jax.random.uniform(kw, (k, k, cin, cout), jnp.float32, -bound, bound)
    b = (jax.random.uniform(kb, (cout,), jnp.float32, -bound, bound)
         if bias else None)
    return {'w': w, 'b': b}


def residual_block_params(key, ch):
    ks = jax.random.split(key, 4)
    return {f'conv{i + 1}': conv_params(ks[i], ch, ch, 3, True) for i in range(4)}


def sequence_params(key, cin, cout):
    k1, k2, k3 = jax.random.split(key, 3)
    return {'conv1': conv_params(k1, cin, cout, 3, True),
            'res': residual_block_params(k2, cout),
            'conv2': conv_params(k3, cout, cout, 3, True)}


def mffn1_params(key, cin, cout):
    ks = jax.random.split(key, 9)
    return {'seq1': sequence_params(ks[0], cin, 64),
            'seq2': sequence_params(ks[1], 64, 64),
            'seq3': sequence_params(ks[2], 64, 64),
            'seq4': sequence_params(ks[3], 64, 64),
            # Sequence5 exists in __init__ but is unused in forward.
            'conv1': conv_params(ks[5], cin, 64, 3, True),
            'conv2': conv_params(ks[6], 64, 64, 3, True),
            'res': residual_block_params(ks[7], 64),
            'conv3': conv_params(ks[8], 64, cout, 3, True)}


def mffn2_params(key, cin, cout):
    ks = jax.random.split(key, 10)
    return {'seq1': sequence_params(ks[0], cin, 64),
            'seq2': sequence_params(ks[1], 64, 64),
            'seq3': sequence_params(ks[2], 64, 64),
            'seq4': sequence_params(ks[3], 64, 64),
            'conv2': conv_params(ks[4], 64, 64, 3, True),
            'res': residual_block_params(ks[5], 64),
            'conv3': conv_params(ks[6], 64, cout, 3, True),
            'ff1': conv_params(ks[7], 128, 64, 1, True),
            'ff2': conv_params(ks[8], 128, 64, 1, True),
            'ff3': conv_params(ks[9], 128, 64, 1, True)}


def sam_params(key, n_feat, k):
    k1, k2 = jax.random.split(key)
    return {'conv1': conv_params(k1, n_feat, n_feat, k, False),
            'conv3': conv_params(k2, n_feat, 1, k, False)}


def pstt_params(key, cin, cout):
    k1, k2, k3, k4 = jax.random.split(key, 4)
    return {'mffn1': mffn1_params(k1, cin, 11),
            'mffn2': mffn2_params(k2, 64, cout),
            'sam': sam_params(k3, 64, 3),
            'conv1': conv_params(k4, 1, 64, 1, False)}


# ---------------------------------------------------------------------------
# Module forwards (mirror the PyTorch code exactly)
# ---------------------------------------------------------------------------

def mffn1_fwd(p, x):
    e1 = seq_call(p['seq1'], x)
    in2 = conv_call(p['conv1'], maxpool2x2(x))
    e2 = seq_call(p['seq2'], in2)
    in3 = maxpool2x2(in2)
    e3 = seq_call(p['seq3'], in3)
    in4 = maxpool2x2(in3)
    e4 = seq_call(p['seq4'], in4)
    y2 = upsample_bilinear(e2, 2)
    y3 = upsample_bilinear(e3, 4)
    y4 = upsample_bilinear(e4, 8)
    y, e5 = tail_call(p['conv2'], p['res'], p['conv3'], e1, y2, y3, y4)
    return y, e2, e3, e4, e5


def mffn2_fwd(p, x, x2, x3, x4):
    e1 = seq_call(p['seq1'], x)
    in2 = maxpool2x2(x)
    y2 = ff_seq_call(p['ff1'], p['seq2'], in2, x2)
    in3 = maxpool2x2(in2)
    y3 = ff_seq_call(p['ff2'], p['seq3'], in3, x3)
    in4 = maxpool2x2(in3)
    y4 = ff_seq_call(p['ff3'], p['seq4'], in4, x4)
    e2 = upsample_bilinear(y2, 2)
    e3 = upsample_bilinear(y3, 4)
    e4 = upsample_bilinear(y4, 8)
    y, _ = tail_call(p['conv2'], p['res'], p['conv3'], e1, e2, e3, e4)
    return y


def pstt_mffn_fwd(p, x):
    y1, e2, e3, e4, e5 = mffn1_fwd(p['mffn1'], x)
    sam = sam_call(p['sam'], p['conv1'], e5, x)
    y2 = mffn2_fwd(p['mffn2'], sam, e2, e3, e4)
    return y1, y2


# ---------------------------------------------------------------------------
# fp32 pure-JAX reference (lax.conv) for validation
# ---------------------------------------------------------------------------

def _ref_conv2d(p, x):
    y = lax.conv_general_dilated(x, p['w'], (1, 1), 'SAME',
                                 dimension_numbers=('NHWC', 'HWIO', 'NHWC'))
    return y if p['b'] is None else y + p['b']


def _ref_resblock(p, x):
    y = jax.nn.relu(_ref_conv2d(p['conv1'], x))
    y = jax.nn.relu(_ref_conv2d(p['conv2'], y))
    x1 = y
    y = jax.nn.relu(_ref_conv2d(p['conv3'], y))
    y = jax.nn.relu(_ref_conv2d(p['conv4'], y))
    return x + x1 + y


def _ref_sequence(p, x):
    y = _ref_conv2d(p['conv1'], x)
    y = _ref_resblock(p['res'], y)
    return jax.nn.relu(_ref_conv2d(p['conv2'], y))


def _ref_mffn1(p, x):
    e1 = _ref_sequence(p['seq1'], x)
    in2 = _ref_conv2d(p['conv1'], maxpool2x2(x))
    e2 = _ref_sequence(p['seq2'], in2)
    in3 = maxpool2x2(in2)
    e3 = _ref_sequence(p['seq3'], in3)
    in4 = maxpool2x2(in3)
    e4 = _ref_sequence(p['seq4'], in4)
    e5 = e1 + upsample_bilinear(e2, 2) + upsample_bilinear(e3, 4) + upsample_bilinear(e4, 8)
    e5 = _ref_conv2d(p['conv2'], e5)
    y = _ref_resblock(p['res'], e5)
    y = _ref_conv2d(p['conv3'], y)
    return y, e2, e3, e4, e5


def _ref_mffn2(p, x, x2, x3, x4):
    e1 = _ref_sequence(p['seq1'], x)
    in2 = maxpool2x2(x)
    y2 = _ref_sequence(p['seq2'], _ref_conv2d(p['ff1'], jnp.concatenate([in2, x2], -1)))
    in3 = maxpool2x2(in2)
    y3 = _ref_sequence(p['seq3'], _ref_conv2d(p['ff2'], jnp.concatenate([in3, x3], -1)))
    in4 = maxpool2x2(in3)
    y4 = _ref_sequence(p['seq4'], _ref_conv2d(p['ff3'], jnp.concatenate([in4, x4], -1)))
    e5 = e1 + upsample_bilinear(y2, 2) + upsample_bilinear(y3, 4) + upsample_bilinear(y4, 8)
    y = _ref_conv2d(p['conv2'], e5)
    y = _ref_resblock(p['res'], y)
    return _ref_conv2d(p['conv3'], y)


def _ref_sam(p, x, x_img):
    x1 = _ref_conv2d(p['conv1'], x)
    gate = jax.nn.sigmoid(_ref_conv2d(p['conv3'], jax.nn.relu(x1)))
    return x_img * gate


def pstt_ref_fwd(p, x):
    y1, e2, e3, e4, e5 = _ref_mffn1(p['mffn1'], x)
    sam = _ref_sam(p['sam'], e5, _ref_conv2d(p['conv1'], x))
    y2 = _ref_mffn2(p['mffn2'], sam, e2, e3, e4)
    return y1, y2


# ---------------------------------------------------------------------------
if __name__ == "__main__":
    _ROLL_SIGN = _detect_roll_sign()

    key = jax.random.PRNGKey(0)
    kp, kx = jax.random.split(key)

    in_channels, out_channels = 1, 3     # PSTT conv1 is conv(1, 64, 1) => cin=1
    N, H, W = 2, 16, 16                  # H, W divisible by 8 (3 maxpools)

    params = pstt_params(kp, in_channels, out_channels)
    x = jax.random.normal(kx, (N, H, W, in_channels), jnp.float32)

    # fp32 reference.
    y1_ref, y2_ref = jax.jit(pstt_ref_fwd)(params, x)
    jax.block_until_ready((y1_ref, y2_ref))

    # Validation run with a small band cap so the multi-band halo path is
    # actually exercised at this toy resolution.
    _BAND_CAP = 8
    y1_a, y2_a = jax.jit(pstt_mffn_fwd)(params, x)
    jax.block_until_ready((y1_a, y2_a))

    # Production-style run (band chosen purely by the VMEM budget).
    _BAND_CAP = 128
    y1, y2 = jax.jit(pstt_mffn_fwd)(params, x)
    jax.block_until_ready((y1, y2))

    def _nerr(a, b):
        a = a.astype(jnp.float32)
        b = b.astype(jnp.float32)
        return float(jnp.max(jnp.abs(a - b)) / (jnp.max(jnp.abs(b)) + 1e-6))

    # Banded and whole-image runs must agree (halo / row-mask correctness).
    assert _nerr(y1_a, y1) < 1e-3, "band-tiling mismatch (y1)"
    assert _nerr(y2_a, y2) < 1e-3, "band-tiling mismatch (y2)"
    # bf16 MXU inputs vs the fp32 reference: loose tolerance over ~25 convs.
    assert _nerr(y1, y1_ref) < 0.2, "y1 deviates from fp32 reference"
    assert _nerr(y2, y2_ref) < 0.2, "y2 deviates from fp32 reference"

    assert y1.shape == (N, H, W, 11)
    assert y2.shape == (N, H, W, out_channels)
    assert bool(jnp.all(jnp.isfinite(y1))) and bool(jnp.all(jnp.isfinite(y2)))
    print("KERNEL_OK")
</pallas_src>

<mosaic_0001>
module attributes {stable_mosaic.version = 11 : i64} {
  func.func @_roll_probe_kernel(%arg0: memref<2x8x128xf32, #tpu.memory_space<vmem>>, %arg1: memref<2x8x128xf32, #tpu.memory_space<vmem>>) attributes {dimension_semantics = [], scalar_prefetch = 0 : i64, scratch_operands = 0 : i64, tpu.core_type = #tpu.core_type<tc>} {
    %c0 = arith.constant 0 : index
    %c0_0 = arith.constant 0 : index
    %c0_1 = arith.constant 0 : index
    %0 = vector.load %arg0[%c0, %c0_0, %c0_1] : memref<2x8x128xf32, #tpu.memory_space<vmem>>, vector<2x8x128xf32>
    %c1_i32 = arith.constant 1 : i32
    %1 = tpu.dynamic_rotate %0 by %c1_i32 dim 1 : vector<2x8x128xf32>, i32 -> vector<2x8x128xf32>
    %c0_2 = arith.constant 0 : index
    %c0_3 = arith.constant 0 : index
    %c0_4 = arith.constant 0 : index
    %2 = vector.load %arg1[%c0_2, %c0_3, %c0_4] : memref<2x8x128xf32, #tpu.memory_space<vmem>>, vector<2x8x128xf32>
    tpu.vector_store %arg1[%c0_2, %c0_3, %c0_4], %1 {strides = array<i32>} : memref<2x8x128xf32, #tpu.memory_space<vmem>>, vector<2x8x128xf32>,
    return
  }
}

</mosaic_0001>

<bundles_post_ra>
// kernel: tpu_custom_call.1
= control target key start
LH: loop header
LB: loop body
LE: loop exit
PB: predicated region body
PF: predicated region fallthrough
CT: control target
= control target key end

     0   :  { %6 = vsyncpa [#allocation3], 0  ;;  %s136_s0 = inlined_call_operand.hbm [shape: f32[2,8,128], index: 0, kind: input, shape index: {}]   ;;  %s137_s1 = inlined_call_operand.hbm [shape: f32[2,8,128], index: 1, kind: output, shape index: {}]  }
   0x1   :  { %7 = vsyncpa [#allocation4], 0  ;;  %s98_s6 = smov [#allocation2]   ;;  %s50_s10 = scalar_lea.hbm %s136_s0, 256 }
   0x2   :  { %s13_s7 = sshll.u32 %s98_s6, 4  ;;  %p51_p0 = scmp.ne.s32.totalorder %s136_s0, %s50_s10  ;;  %s14_s7 = int_to_ptr.vmem [resolvable:$true] %s13_s7 }
   0x3   :  { %p54_p1 = scmp.lt.u32.totalorder %s50_s10, %s136_s0 }
   0x5   :  { %p56_p2 = pnand %p54_p1, %p51_p0 }
   0x7   :  { %59 = shalt.err (!%p56_p2)
}
   0x8   :  { %s60_s15 = scalar_lea.vmem %s14_s7, 256  ;;  %p65_p4 = scmp.lt.s32.totalorder %s14_s7, %s14_s7 }
   0x9   :  { %p61_p3 = scmp.ne.s32.totalorder %s14_s7, %s60_s15  ;;  %p66_p5 = scmp.lt.s32.totalorder %s60_s15, %s60_s15 }
   0xb   :  { %p67_p6 = por %p66_p5, %p65_p4 }
   0xd   :  { %p68_p7 = pnand %p67_p6, %p61_p3 }
   0xf   :  { %71 = shalt.err (!%p68_p7)
}
  0x10   :  { %s99_s16 = smov 128   ;;  %s100_s17 = smov 8  }
  0x11   :  { %19 = dma.hbm_to_vmem [thread:$0]  %s136_s0, 256, %s14_s7, [#allocation3], %s99_s16, %s99_s16, %s100_s17  }
  0x12   :  { %94 = dma.done.wait [#allocation3], 256  }
  0x13   :  { %95 = vsyncadd [#allocation3], 4294967040  ;;  %s101_s20 = smov [#allocation5]   ;;  %v23_v0 = vld [vmem:[#allocation2] sm:$0xff]  ;;  %v24_v1 = vld [vmem:[#allocation2 + $0x8] sm:$0xff] }
  0x14   :  { %s34_s21 = sshll.u32 %s101_s20, 4  ;;  %v25_v2 = vrot.slane %v23_v0, 7  ;;  %v26_v3 = vrot.slane %v24_v1, 7  ;;  %s35_s21 = int_to_ptr.vmem [resolvable:$true] %s34_s21 }
  0x15   :  { %s72_s22 = scalar_lea.vmem %s35_s21, 256  ;;  %p77_p9 = scmp.lt.s32.totalorder %s35_s21, %s35_s21 }
  0x16   :  { %27 = vst [vmem:[#allocation5] sm:$0xff] %v25_v2  ;;  %28 = vst [vmem:[#allocation5 + $0x8] sm:$0xff] %v26_v3  ;;  %p73_p8 = scmp.ne.s32.totalorder %s35_s21, %s72_s22  ;;  %p78_p10 = scmp.lt.s32.totalorder %s72_s22, %s72_s22 }
  0x18   :  { %p79_p11 = por %p78_p10, %p77_p9 }
  0x1a   :  { %p80_p12 = pnand %p79_p11, %p73_p8 }
  0x1c   :  { %83 = shalt.err (!%p80_p12)
}
  0x1d   :  { %s84_s24 = scalar_lea.hbm %s137_s1, 256 }
  0x1e   :  { %p85_p13 = scmp.ne.s32.totalorder %s137_s1, %s84_s24  ;;  %p88_p0 = scmp.lt.u32.totalorder %s84_s24, %s137_s1 }
  0x20   :  { %p90_p1 = pnand %p88_p0, %p85_p13 }
  0x22   :  { %93 = shalt.err (!%p90_p1)
}
  0x23   :  { %40 = dma.vmem_to_hbm [thread:$0]  %s35_s21, 256, %s137_s1, [#allocation4], %s99_s16, %s99_s16, %s100_s17  }
  0x24   :  { %96 = dma.done.wait [#allocation4], 256  }
  0x25   :  { %97 = vsyncadd [#allocation4], 4294967040 }
  0x26   :  { %44 = vsyncpa [#allocation3], 1 }
  0x27   :  { %45 = vsyncpa [#allocation4], 1 }

</bundles_post_ra>
